<compile_context>
chip_gen: v7x
topology: tpu7x:2x2x1
jax: 0.10.0
libtpu: 0.0.40
codegen_flags: <defaults>
</compile_context>

<pallas_src>
import jax
import jax.numpy as jnp
from jax.experimental import pallas as pl
from jax.experimental.pallas import tpu as pltpu


def _round_up(x, m):
    return (x + m - 1) // m * m


def _make_kernel(downsample, L, b_tile, C1):
    W = L + 2  # haloed width on which conv1 is evaluated

    def _compute(x_ref, w1_ref, b1_ref, w2_ref, b2_ref, o_ref, w3_ref, b3_ref):
        w1 = w1_ref[...]                       # (C1p, 3*Cinp)
        b1 = b1_ref[...]                       # (C1p, 1)
        w2 = w2_ref[...]                       # (C1p, 3*C1p)
        b2 = b2_ref[...]
        c1p = w1.shape[0]

        # One VMEM view per batch element of the tile (Cinp, L+4), zero halo of 2.
        xs = [x_ref[b] for b in range(b_tile)]

        # ---- conv1 (+bias, ReLU) ------------------------------------------------
        # im2col: batch elements side by side along lanes, the 3 taps stacked along
        # the contraction (sublane) axis -> ONE MXU matmul for the whole tile.
        xim1 = jnp.concatenate(
            [jnp.concatenate([x[:, k:k + W] for x in xs], axis=1) for k in range(3)],
            axis=0)                                                  # (3Cinp, bT*W)
        z1 = jnp.dot(w1, xim1, preferred_element_type=jnp.float32) + b1

        # Zero the per-batch halo columns: that IS the zero-padded ReLU(conv1).
        col = jax.lax.broadcasted_iota(jnp.int32, (c1p, W), 1)
        inner = jnp.logical_and(col != 0, col != W - 1).astype(jnp.float32)
        mask = jnp.concatenate([inner] * b_tile, axis=1)             # (C1p, bT*W)
        y1p = (mask * jnp.maximum(z1, 0.0)).astype(w2.dtype)

        # ---- conv2 (+bias) ------------------------------------------------------
        yim = jnp.concatenate(
            [jnp.concatenate(
                [y1p[:, b * W + k: b * W + k + L] for b in range(b_tile)], axis=1)
             for k in range(3)], axis=0)                             # (3C1p, bT*L)
        y2 = jnp.dot(w2, yim, preferred_element_type=jnp.float32) + b2

        # ---- residual branch ----------------------------------------------------
        if downsample:
            w3 = w3_ref[...]                   # (C1p, 3*Cinp)
            b3 = b3_ref[...]
            xim3 = jnp.concatenate(
                [jnp.concatenate([x[:, 1 + k: 1 + k + L] for x in xs], axis=1)
                 for k in range(3)], axis=0)                         # (3Cinp, bT*L)
            xres = jnp.dot(w3, xim3, preferred_element_type=jnp.float32) + b3
        else:
            # identity path (Cin == C1 -> Cinp == C1p)
            xres = jnp.concatenate([x[:, 2:2 + L] for x in xs],
                                   axis=1).astype(jnp.float32)       # (Cinp, bT*L)

        out = jnp.maximum(y2 + xres, 0.0)                            # (C1p, bT*L)
        for b in range(b_tile):
            o_ref[b] = out[:C1, b * L:(b + 1) * L].astype(o_ref.dtype)

    if downsample:
        def kernel(x_ref, w1_ref, b1_ref, w2_ref, b2_ref, w3_ref, b3_ref, o_ref):
            _compute(x_ref, w1_ref, b1_ref, w2_ref, b2_ref, o_ref, w3_ref, b3_ref)
    else:
        def kernel(x_ref, w1_ref, b1_ref, w2_ref, b2_ref, o_ref):
            _compute(x_ref, w1_ref, b1_ref, w2_ref, b2_ref, o_ref, None, None)
    return kernel


def _fuse_conv_weight(w, cin_p, cout_p, dtype):
    """PyTorch conv1d weight (Cout, Cin, 3) -> fused-tap matmul weight (cout_p, 3*cin_p).

    Layout: wf[o, k*cin_p + c] = w[o, c, k], zero-padded channels."""
    cout, cin, _ = w.shape
    w = jnp.pad(w.astype(dtype), ((0, cout_p - cout), (0, cin_p - cin), (0, 0)))
    return jnp.transpose(w, (0, 2, 1)).reshape(cout_p, 3 * cin_p)


def _pad_bias(b, cout_p, dtype):
    cout = b.shape[0]
    return jnp.pad(b.astype(dtype), (0, cout_p - cout)).reshape(cout_p, 1)


def residual_forward(x, params, downsample, *, batch_tile=None,
                     compute_dtype=jnp.float32):
    """x: (N, Cin, L) float32 (PyTorch NCL). Returns (N, C1, L) float32."""
    N, Cin, L = x.shape
    C1 = params["w1"].shape[0]
    if not downsample and Cin != C1:
        raise ValueError("identity residual requires input_channels == num_channels")

    cin_p = _round_up(Cin, 8)          # sublane-align channels (aligned in-kernel concat)
    c1_p = _round_up(C1, 8)
    if batch_tile is not None:
        b_tile = batch_tile
    else:
        # aim for a few hundred lanes per matmul, but never more than 8 batch elements
        b_tile = max(1, min(N, 8, max(1, 512 // max(L, 1))))
    n_p = _round_up(N, b_tile)

    # Single wrapper-side pad: batch -> n_p, channels -> cin_p, 2-column halo along L.
    x2 = jnp.pad(x.astype(compute_dtype),
                 ((0, n_p - N), (0, cin_p - Cin), (2, 2)))        # (n_p, cin_p, L+4)

    w1 = _fuse_conv_weight(params["w1"], cin_p, c1_p, compute_dtype)
    b1 = _pad_bias(params["b1"], c1_p, compute_dtype)
    w2 = _fuse_conv_weight(params["w2"], c1_p, c1_p, compute_dtype)
    b2 = _pad_bias(params["b2"], c1_p, compute_dtype)

    in_specs = [
        pl.BlockSpec((b_tile, cin_p, L + 4), lambda i: (i, 0, 0)),
        pl.BlockSpec((c1_p, 3 * cin_p), lambda i: (0, 0)),
        pl.BlockSpec((c1_p, 1), lambda i: (0, 0)),
        pl.BlockSpec((c1_p, 3 * c1_p), lambda i: (0, 0)),
        pl.BlockSpec((c1_p, 1), lambda i: (0, 0)),
    ]
    args = [x2, w1, b1, w2, b2]
    if downsample:
        w3 = _fuse_conv_weight(params["w3"], cin_p, c1_p, compute_dtype)
        b3 = _pad_bias(params["b3"], c1_p, compute_dtype)
        in_specs += [
            pl.BlockSpec((c1_p, 3 * cin_p), lambda i: (0, 0)),
            pl.BlockSpec((c1_p, 1), lambda i: (0, 0)),
        ]
        args += [w3, b3]

    # Only raise the scoped-VMEM limit when the blocks actually need it; stay within
    # v7x's 64 MiB physical VMEM.
    itemsize = jnp.dtype(compute_dtype).itemsize
    in_block = b_tile * cin_p * (L + 4) * itemsize
    out_block = b_tile * C1 * L * 4
    w_bytes = (c1_p * 3 * (cin_p + c1_p) + 2 * c1_p) * itemsize * (2 if downsample else 1)
    inter = (6 * cin_p + 9 * c1_p) * b_tile * (L + 4) * 4   # in-kernel f32 intermediates
    est_vmem = 2 * (in_block + out_block) + 2 * w_bytes + inter
    cp_kwargs = dict(dimension_semantics=("parallel",))
    if est_vmem > 16 * 1024 * 1024:
        cp_kwargs["vmem_limit_bytes"] = int(min(int(1.5 * est_vmem), 64 * 1024 * 1024))

    out = pl.pallas_call(
        _make_kernel(downsample, L, b_tile, C1),
        out_shape=jax.ShapeDtypeStruct((n_p, C1, L), jnp.float32),
        grid=(n_p // b_tile,),
        in_specs=in_specs,
        out_specs=pl.BlockSpec((b_tile, C1, L), lambda i: (i, 0, 0)),
        compiler_params=pltpu.CompilerParams(**cp_kwargs),
    )(*args)

    return out[:N] if n_p != N else out


# ---------------- pure-JAX reference (same math as nn.Conv1d) ----------------
def _conv1d_ref(x, w, b):
    # x: (N, Cin, L), w: (Cout, Cin, 3), b: (Cout,)
    L = x.shape[2]
    xp = jnp.pad(x, ((0, 0), (0, 0), (1, 1)))
    y = b[None, :, None]
    for k in range(3):
        y = y + jnp.einsum("ncl,oc->nol", xp[:, :, k:k + L], w[:, :, k],
                           precision=jax.lax.Precision.HIGHEST)
    return y


def _residual_ref(x, params, downsample):
    y = jax.nn.relu(_conv1d_ref(x, params["w1"], params["b1"]))
    y = _conv1d_ref(y, params["w2"], params["b2"])
    xr = _conv1d_ref(x, params["w3"], params["b3"]) if downsample else x
    return jax.nn.relu(y + xr)


def _init_params(key, cin, c1, downsample):
    ks = jax.random.split(key, 6)
    p = {
        "w1": 0.1 * jax.random.normal(ks[0], (c1, cin, 3), jnp.float32),
        "b1": 0.1 * jax.random.normal(ks[1], (c1,), jnp.float32),
        "w2": 0.1 * jax.random.normal(ks[2], (c1, c1, 3), jnp.float32),
        "b2": 0.1 * jax.random.normal(ks[3], (c1,), jnp.float32),
    }
    if downsample:
        p["w3"] = 0.1 * jax.random.normal(ks[4], (c1, cin, 3), jnp.float32)
        p["b3"] = 0.1 * jax.random.normal(ks[5], (c1,), jnp.float32)
    return p


if __name__ == "__main__":
    key = jax.random.PRNGKey(0)
    k_x1, k_p1, k_x2, k_p2 = jax.random.split(key, 4)

    # Case 1: identity residual (input_channels == num_channels, no downsampling)
    N, C, L = 2, 8, 16
    x1 = jax.random.normal(k_x1, (N, C, L), jnp.float32)
    p1 = _init_params(k_p1, C, C, downsample=False)
    y1 = jax.block_until_ready(residual_forward(x1, p1, downsample=False))
    r1 = _residual_ref(x1, p1, downsample=False)
    assert y1.shape == (N, C, L)
    assert jnp.max(jnp.abs(y1 - r1)) < 1e-3

    # Case 2: projection residual (dowmsampling=True, stride=1)
    Cin, C1 = 4, 8
    x2 = jax.random.normal(k_x2, (N, Cin, L), jnp.float32)
    p2 = _init_params(k_p2, Cin, C1, downsample=True)
    y2 = jax.block_until_ready(residual_forward(x2, p2, downsample=True))
    r2 = _residual_ref(x2, p2, downsample=True)
    assert y2.shape == (N, C1, L)
    assert jnp.max(jnp.abs(y2 - r2)) < 1e-3

    print("KERNEL_OK")
</pallas_src>

<mosaic_0001>
module attributes {stable_mosaic.version = 11 : i64} {
  func.func @kernel(%arg0: i32, %arg1: memref<2x8x20xf32, #tpu.memory_space<vmem>>, %arg2: memref<8x24xf32, #tpu.memory_space<vmem>>, %arg3: memref<8x1xf32, #tpu.memory_space<vmem>>, %arg4: memref<8x24xf32, #tpu.memory_space<vmem>>, %arg5: memref<8x1xf32, #tpu.memory_space<vmem>>, %arg6: memref<2x8x16xf32, #tpu.memory_space<vmem>>) attributes {dimension_semantics = [#tpu.dimension_semantics<parallel>], iteration_bounds = array<i64: 1>, scalar_prefetch = 0 : i64, scratch_operands = 0 : i64, tpu.core_type = #tpu.core_type<tc>, window_params = [{transform_indices = @transform_0, window_bounds = array<i64: 2, 8, 20>}, {pipeline_mode = #tpu.pipeline_mode<synchronous>, transform_indices = @transform_1, window_bounds = array<i64: 8, 24>}, {pipeline_mode = #tpu.pipeline_mode<synchronous>, transform_indices = @transform_2, window_bounds = array<i64: 8, 1>}, {pipeline_mode = #tpu.pipeline_mode<synchronous>, transform_indices = @transform_3, window_bounds = array<i64: 8, 24>}, {pipeline_mode = #tpu.pipeline_mode<synchronous>, transform_indices = @transform_4, window_bounds = array<i64: 8, 1>}, {transform_indices = @transform_5, window_bounds = array<i64: 2, 8, 16>}]} {
    %c0 = arith.constant 0 : index
    %c0_0 = arith.constant 0 : index
    %0 = vector.load %arg2[%c0, %c0_0] : memref<8x24xf32, #tpu.memory_space<vmem>>, vector<8x24xf32>
    %c0_1 = arith.constant 0 : index
    %c0_2 = arith.constant 0 : index
    %1 = vector.load %arg3[%c0_1, %c0_2] : memref<8x1xf32, #tpu.memory_space<vmem>>, vector<8x1xf32>
    %c0_3 = arith.constant 0 : index
    %c0_4 = arith.constant 0 : index
    %2 = vector.load %arg4[%c0_3, %c0_4] : memref<8x24xf32, #tpu.memory_space<vmem>>, vector<8x24xf32>
    %c0_5 = arith.constant 0 : index
    %c0_6 = arith.constant 0 : index
    %3 = vector.load %arg5[%c0_5, %c0_6] : memref<8x1xf32, #tpu.memory_space<vmem>>, vector<8x1xf32>
    %c0_7 = arith.constant 0 : index
    %c0_8 = arith.constant 0 : index
    %c0_9 = arith.constant 0 : index
    %4 = vector.load %arg1[%c0_7, %c0_8, %c0_9] : memref<2x8x20xf32, #tpu.memory_space<vmem>>, vector<1x8x20xf32>
    %5 = vector.shape_cast %4 : vector<1x8x20xf32> to vector<8x20xf32>
    %c1 = arith.constant 1 : index
    %c0_10 = arith.constant 0 : index
    %c0_11 = arith.constant 0 : index
    %6 = vector.load %arg1[%c1, %c0_10, %c0_11] : memref<2x8x20xf32, #tpu.memory_space<vmem>>, vector<1x8x20xf32>
    %7 = vector.shape_cast %6 : vector<1x8x20xf32> to vector<8x20xf32>
    %8 = vector.extract_strided_slice %5 {offsets = [0, 0], sizes = [8, 18], strides = [1, 1]} : vector<8x20xf32> to vector<8x18xf32>
    %9 = vector.extract_strided_slice %7 {offsets = [0, 0], sizes = [8, 18], strides = [1, 1]} : vector<8x20xf32> to vector<8x18xf32>
    %10 = tpu.concatenate %8, %9 in 1 : vector<8x18xf32>, vector<8x18xf32> -> vector<8x36xf32>
    %11 = vector.extract_strided_slice %5 {offsets = [0, 1], sizes = [8, 18], strides = [1, 1]} : vector<8x20xf32> to vector<8x18xf32>
    %12 = vector.extract_strided_slice %7 {offsets = [0, 1], sizes = [8, 18], strides = [1, 1]} : vector<8x20xf32> to vector<8x18xf32>
    %13 = tpu.concatenate %11, %12 in 1 : vector<8x18xf32>, vector<8x18xf32> -> vector<8x36xf32>
    %14 = vector.extract_strided_slice %5 {offsets = [0, 2], sizes = [8, 18], strides = [1, 1]} : vector<8x20xf32> to vector<8x18xf32>
    %15 = vector.extract_strided_slice %7 {offsets = [0, 2], sizes = [8, 18], strides = [1, 1]} : vector<8x20xf32> to vector<8x18xf32>
    %16 = tpu.concatenate %14, %15 in 1 : vector<8x18xf32>, vector<8x18xf32> -> vector<8x36xf32>
    %17 = tpu.concatenate %10, %13, %16 in 0 : vector<8x36xf32>, vector<8x36xf32>, vector<8x36xf32> -> vector<24x36xf32>
    %cst = arith.constant dense<0.000000e+00> : vector<8x36xf32>
    %18 = tpu.matmul %0, %17, %cst {dimension_numbers = #tpu.dot_dimension_numbers<[1], [0], [0], [1], [0, 0, 1, 1], [], []>} : vector<8x24xf32>, vector<24x36xf32>, vector<8x36xf32> -> vector<8x36xf32>
    %19 = vector.broadcast %1 : vector<8x1xf32> to vector<8x36xf32>
    %20 = arith.addf %18, %19 : vector<8x36xf32>
    %21 = tpu.iota {dimensions = array<i32: 1>} : vector<8x18xi32>
    %c0_i32 = arith.constant 0 : i32
    %22 = vector.broadcast %c0_i32 : i32 to vector<8x18xi32>
    %23 = arith.cmpi ne, %21, %22 : vector<8x18xi32>
    %c17_i32 = arith.constant 17 : i32
    %24 = vector.broadcast %c17_i32 : i32 to vector<8x18xi32>
    %25 = arith.cmpi ne, %21, %24 : vector<8x18xi32>
    %26 = arith.andi %23, %25 : vector<8x18xi1>
    %27 = arith.extui %26 : vector<8x18xi1> to vector<8x18xi32>
    %28 = arith.sitofp %27 : vector<8x18xi32> to vector<8x18xf32>
    %29 = tpu.concatenate %28, %28 in 1 : vector<8x18xf32>, vector<8x18xf32> -> vector<8x36xf32>
    %cst_12 = arith.constant 0.000000e+00 : f32
    %30 = vector.broadcast %cst_12 : f32 to vector<8x36xf32>
    %31 = arith.maximumf %20, %30 : vector<8x36xf32>
    %32 = arith.mulf %29, %31 : vector<8x36xf32>
    %33 = vector.extract_strided_slice %32 {offsets = [0, 0], sizes = [8, 16], strides = [1, 1]} : vector<8x36xf32> to vector<8x16xf32>
    %34 = vector.extract_strided_slice %32 {offsets = [0, 18], sizes = [8, 16], strides = [1, 1]} : vector<8x36xf32> to vector<8x16xf32>
    %35 = tpu.concatenate %33, %34 in 1 : vector<8x16xf32>, vector<8x16xf32> -> vector<8x32xf32>
    %36 = vector.extract_strided_slice %32 {offsets = [0, 1], sizes = [8, 16], strides = [1, 1]} : vector<8x36xf32> to vector<8x16xf32>
    %37 = vector.extract_strided_slice %32 {offsets = [0, 19], sizes = [8, 16], strides = [1, 1]} : vector<8x36xf32> to vector<8x16xf32>
    %38 = tpu.concatenate %36, %37 in 1 : vector<8x16xf32>, vector<8x16xf32> -> vector<8x32xf32>
    %39 = vector.extract_strided_slice %32 {offsets = [0, 2], sizes = [8, 16], strides = [1, 1]} : vector<8x36xf32> to vector<8x16xf32>
    %40 = vector.extract_strided_slice %32 {offsets = [0, 20], sizes = [8, 16], strides = [1, 1]} : vector<8x36xf32> to vector<8x16xf32>
    %41 = tpu.concatenate %39, %40 in 1 : vector<8x16xf32>, vector<8x16xf32> -> vector<8x32xf32>
    %42 = tpu.concatenate %35, %38, %41 in 0 : vector<8x32xf32>, vector<8x32xf32>, vector<8x32xf32> -> vector<24x32xf32>
    %cst_13 = arith.constant dense<0.000000e+00> : vector<8x32xf32>
    %43 = tpu.matmul %2, %42, %cst_13 {dimension_numbers = #tpu.dot_dimension_numbers<[1], [0], [0], [1], [0, 0, 1, 1], [], []>} : vector<8x24xf32>, vector<24x32xf32>, vector<8x32xf32> -> vector<8x32xf32>
    %44 = vector.broadcast %3 : vector<8x1xf32> to vector<8x32xf32>
    %45 = arith.addf %43, %44 : vector<8x32xf32>
    %46 = vector.extract_strided_slice %5 {offsets = [0, 2], sizes = [8, 16], strides = [1, 1]} : vector<8x20xf32> to vector<8x16xf32>
    %47 = vector.extract_strided_slice %7 {offsets = [0, 2], sizes = [8, 16], strides = [1, 1]} : vector<8x20xf32> to vector<8x16xf32>
    %48 = tpu.concatenate %46, %47 in 1 : vector<8x16xf32>, vector<8x16xf32> -> vector<8x32xf32>
    %49 = arith.addf %45, %48 : vector<8x32xf32>
    %cst_14 = arith.constant 0.000000e+00 : f32
    %50 = vector.broadcast %cst_14 : f32 to vector<8x32xf32>
    %51 = arith.maximumf %49, %50 : vector<8x32xf32>
    %52 = vector.extract_strided_slice %51 {offsets = [0, 0], sizes = [8, 16], strides = [1, 1]} : vector<8x32xf32> to vector<8x16xf32>
    %c0_15 = arith.constant 0 : index
    %c0_16 = arith.constant 0 : index
    %c0_17 = arith.constant 0 : index
    %53 = vector.load %arg6[%c0_15, %c0_16, %c0_17] : memref<2x8x16xf32, #tpu.memory_space<vmem>>, vector<1x8x16xf32>
    %54 = vector.shape_cast %53 : vector<1x8x16xf32> to vector<8x16xf32>
    %55 = vector.shape_cast %52 : vector<8x16xf32> to vector<1x8x16xf32>
    tpu.vector_store %arg6[%c0_15, %c0_16, %c0_17], %55 {strides = array<i32>} : memref<2x8x16xf32, #tpu.memory_space<vmem>>, vector<1x8x16xf32>,
    %56 = vector.extract_strided_slice %51 {offsets = [0, 16], sizes = [8, 16], strides = [1, 1]} : vector<8x32xf32> to vector<8x16xf32>
    %c1_18 = arith.constant 1 : index
    %c0_19 = arith.constant 0 : index
    %c0_20 = arith.constant 0 : index
    %57 = vector.load %arg6[%c1_18, %c0_19, %c0_20] : memref<2x8x16xf32, #tpu.memory_space<vmem>>, vector<1x8x16xf32>
    %58 = vector.shape_cast %57 : vector<1x8x16xf32> to vector<8x16xf32>
    %59 = vector.shape_cast %56 : vector<8x16xf32> to vector<1x8x16xf32>
    tpu.vector_store %arg6[%c1_18, %c0_19, %c0_20], %59 {strides = array<i32>} : memref<2x8x16xf32, #tpu.memory_space<vmem>>, vector<1x8x16xf32>,
    return
  }
  func.func @transform_0(%arg0: i32) -> (i32, i32, i32) {
    %c0_i32 = arith.constant 0 : i32
    %c0_i32_0 = arith.constant 0 : i32
    %c0_i32_1 = arith.constant 0 : i32
    return %arg0, %c0_i32, %c0_i32_0 : i32, i32, i32
  }
  func.func @transform_1(%arg0: i32) -> (i32, i32) {
    %c0_i32 = arith.constant 0 : i32
    %c0_i32_0 = arith.constant 0 : i32
    %c0_i32_1 = arith.constant 0 : i32
    return %c0_i32, %c0_i32_0 : i32, i32
  }
  func.func @transform_2(%arg0: i32) -> (i32, i32) {
    %c0_i32 = arith.constant 0 : i32
    %c0_i32_0 = arith.constant 0 : i32
    %c0_i32_1 = arith.constant 0 : i32
    return %c0_i32, %c0_i32_0 : i32, i32
  }
  func.func @transform_3(%arg0: i32) -> (i32, i32) {
    %c0_i32 = arith.constant 0 : i32
    %c0_i32_0 = arith.constant 0 : i32
    %c0_i32_1 = arith.constant 0 : i32
    return %c0_i32, %c0_i32_0 : i32, i32
  }
  func.func @transform_4(%arg0: i32) -> (i32, i32) {
    %c0_i32 = arith.constant 0 : i32
    %c0_i32_0 = arith.constant 0 : i32
    %c0_i32_1 = arith.constant 0 : i32
    return %c0_i32, %c0_i32_0 : i32, i32
  }
  func.func @transform_5(%arg0: i32) -> (i32, i32, i32) {
    %c0_i32 = arith.constant 0 : i32
    %c0_i32_0 = arith.constant 0 : i32
    %c0_i32_1 = arith.constant 0 : i32
    return %arg0, %c0_i32, %c0_i32_0 : i32, i32, i32
  }
}

</mosaic_0001>

<bundles_post_ra>
// kernel: tpu_custom_call.1
= control target key start
LH: loop header
LB: loop body
LE: loop exit
PB: predicated region body
PF: predicated region fallthrough
CT: control target
= control target key end

     0   :  { %10 = vsyncpa [#allocation3], 0  ;;  %s489_s0 = inlined_call_operand.vmem [shape: f32[2,8,20], index: 0, kind: input, shape index: {}]   ;;  %s490_s1 = inlined_call_operand.hbm [shape: f32[8,24], index: 1, kind: input, shape index: {}]   ;;  %s491_s2 = inlined_call_operand.vmem [shape: f32[8,1], index: 2, kind: input, shape index: {}]   ;;  %s492_s3 = inlined_call_operand.vmem [shape: f32[8,24], index: 3, kind: input, shape index: {}]   ;;  %s493_s4 = inlined_call_operand.vmem [shape: f32[8,1], index: 4, kind: input, shape index: {}]   ;;  %s494_s5 = inlined_call_operand.hbm [shape: f32[2,8,16], index: 5, kind: output, shape index: {}]  }
   0x1   :  { %11 = vsyncpa [#allocation4], 0  ;;  %s382_s18 = smov [#allocation2]   ;;  %s334_s22 = scalar_lea.hbm %s490_s1, 128 }
   0x2   :  { %s20_s19 = sshll.u32 %s382_s18, 4  ;;  %p335_p0 = scmp.ne.s32.totalorder %s490_s1, %s334_s22  ;;  %s21_s19 = int_to_ptr.vmem [resolvable:$true] %s20_s19 }
   0x3   :  { %p338_p1 = scmp.lt.u32.totalorder %s334_s22, %s490_s1 }
   0x5   :  { %p340_p2 = pnand %p338_p1, %p335_p0 }
   0x7   :  { %343 = shalt.err (!%p340_p2)
}
   0x8   :  { %s344_s27 = scalar_lea.vmem %s21_s19, 128  ;;  %p349_p4 = scmp.lt.s32.totalorder %s21_s19, %s21_s19 }
   0x9   :  { %p345_p3 = scmp.ne.s32.totalorder %s21_s19, %s344_s27  ;;  %p350_p5 = scmp.lt.s32.totalorder %s344_s27, %s344_s27 }
   0xb   :  { %p351_p6 = por %p350_p5, %p349_p4 }
   0xd   :  { %p352_p7 = pnand %p351_p6, %p345_p3 }
   0xf   :  { %355 = shalt.err (!%p352_p7)
}
  0x10   :  { %23 = dma.hbm_to_vmem [thread:$0]  %s490_s1, 128, %s21_s19, [#allocation3]  }
  0x11   :  { %378 = dma.done.wait [#allocation3], 128  }
  0x12   :  { %379 = vsyncadd [#allocation3], 4294967168  ;;  %v383_v0 = vmov 0.0|0.0   ;;  %vm384_vm0 = vmmov 0   ;;  %v385_v1 = vmov 0.0   ;;  %v279_v2 = vld [vmem:[%s489_s0 + $0x8] sm:$0xff]  ;;  %v140_v3 = vlaneseq }
  0x13   :  { %309 = vmatprep.subr.bf16.mxu0 %v383_v0  ;;  %312 = vmatprep.subr.bf16.mxu1 %v383_v0  ;;  %s386_s7 = smov 18   ;;  %s387_s8 = smov 17   ;;  %v37_v4 = vld [vmem:[%s489_s0] sm:$0xff]  ;;  %v388_v5 = vmov 0   ;;  %vm44_vm4 = vcmask 146432   ;;  %vm66_vm5 = vcmask 195584  }
  0x14   :  { %297 = vmatprep.mubr.msk.f32.mxu0 %vm384_vm0, %v385_v1  ;;  %306 = vmatprep.mubr.msk.f32.mxu1 %vm384_vm0, %v385_v1  ;;  %v141_v6 = vand.u32 127, %v140_v3  ;;  %s389_s10 = smov 127   ;;  %s390_s11 = smov 126   ;;  %v34_v7 = vld [vmem:[%s491_s2] sm:$0xff]  ;;  %vm158_vm6 = vcmask 130048  }
  0x15   :  { %41 = vrot.lane.b32.xlu0 %v279_v2, %s386_s7  ;;  %50 = vrot.lane.b32.xlu1 %v279_v2, %s387_s8  ;;  %s391_s14 = smov 16   ;;  %v33_v18 = vld [vmem:[#allocation2] sm:$0xff]  ;;  %s392_s0 = smov 124  }
  0x16   :  { %332 = vset.pattern.permute.xlu1 %v388_v5  ;;  %333 = vset.pattern.permute.xlu0 %v388_v5  ;;  %vm142_vm1 = vcmp.ne.s32.totalorder %v141_v6, 0  ;;  %vm143_vm2 = vcmp.ne.s32.totalorder %v141_v6, 17  ;;  %s393_s2 = smov 125   ;;  %v36_v27 = vld [vmem:[%s493_s4] sm:$0xff]  ;;  %s394_s17 = smov 14  }
  0x17   :  { %vm144_vm3 = vmand %vm142_vm1, %vm143_vm2  ;;  %v35_v35 = vld [vmem:[%s492_s3] sm:$0xff]  ;;  %s395_s4 = smov 112   ;;  %s396_s20 = smov [#allocation5]  }
  0x18   :  { %v281_v8 = vsel %vm144_vm3, 1.0, %v385_v1  ;;  %s267_s3 = sshll.u32 %s396_s20, 4  ;;  %s268_s3 = int_to_ptr.vmem [resolvable:$true] %s267_s3 }
  0x19   :  { %47 = vrot.lane.b32.xlu0 %v37_v4, %s389_s10  ;;  %54 = vrot.lane.b32.xlu1 %v37_v4, %s390_s11  ;;  %s356_s21 = scalar_lea.vmem %s268_s3, 256  ;;  %p361_p9 = scmp.lt.s32.totalorder %s268_s3, %s268_s3 }
  0x1a   :  { %p357_p8 = scmp.ne.s32.totalorder %s268_s3, %s356_s21  ;;  %p362_p10 = scmp.lt.s32.totalorder %s356_s21, %s356_s21 }
  0x1c   :  { %p363_p11 = por %p362_p10, %p361_p9 }
  0x1d   :  { %57 = vrot.lane.b32.xlu0 %v279_v2, %s391_s14  ;;  %63 = vperm.xlu1 %332, %v34_v7  }
  0x1e   :  { %p364_p12 = pnand %p363_p11, %p357_p8 }
  0x21   :  { %148 = vrot.lane.b32.xlu0 %v281_v8, %s386_s7 }
  0x87   :  { %v42_v9 = vpop.permute.xlu0 %41  ;;  %v51_v10 = vpop.permute.xlu1 %50 }
  0x88   :  { %v45_v12 = vsel %vm44_vm4, %v37_v4, %v42_v9 }
  0x8b   :  { %v48_v11 = vpop.permute.xlu0 %47  ;;  %v55_v15 = vpop.permute.xlu1 %54 }
  0x8c   :  { %v53_v13 = vsel %vm44_vm4, %v48_v11, %v51_v10 }
  0x8d   :  { %v310_v14 = vpack.c.bf16 %v53_v13, %v45_v12 }
  0x8f   :  { %311 = vmatpush3.bf16.msra.mxu0 %v310_v14  ;;  %v58_v16 = vpop.permute.xlu0 %57 }
  0x90   :  { %295 = vmatprep.subr.mxu0 %v385_v1  ;;  %v60_v17 = vsel %vm44_vm4, %v55_v15, %v58_v16 }
  0x93   :  { %296 = vmatpush3.msra.mxu0 %v60_v17  ;;  %v149_v20 = vpop.permute.xlu0 %148 }
  0x94   :  { %298 = vmatmul.mubr.msk.f32.vlgmr.msra.gmra.mrb[0].mxu0 %vm66_vm5, %v33_v18  ;;  %v151_v24 = vsel %vm44_vm4, %v281_v8, %v149_v20 }
  0x9c   :  { %v64_v19 = vpop.permute.xlu1 %63 }
 0x167   :  { %v136_v21 = vpop.f32.mrb[0].mxu0 }
 0x168   :  { %v137_v22 = vadd.f32 %v136_v21, %v64_v19  ;;  %v299_v23 = vpop.f32.mrb[1].mxu0 }
 0x16a   :  { %v152_v25 = vmax.f32 %v137_v22, 0.0 }
 0x16c   :  { %v153_v26 = vmul.f32 %v152_v25, %v151_v24 }
 0x16e   :  { %160 = vrot.lane.b32.xlu0 %v153_v26, %s389_s10  ;;  %155 = vrot.lane.b32.xlu1 %v153_v26, %s390_s11 }
 0x172   :  { %167 = vrot.lane.b32.xlu0 %v153_v26, %s392_s0  ;;  %163 = vrot.lane.b32.xlu1 %v153_v26, %s393_s2 }
 0x176   :  { %249 = vrot.lane.b32.xlu0 %v279_v2, %s394_s17  ;;  %173 = vperm.xlu1 %332, %v36_v27  }
 0x1e0   :  { %v156_v28 = vpop.permute.xlu1 %155  ;;  %v161_v29 = vpop.permute.xlu0 %160 }
 0x1e1   :  { %v159_v31 = vsel %vm158_vm6, %v153_v26, %v156_v28 }
 0x1e4   :  { %v164_v30 = vpop.permute.xlu1 %163  ;;  %v168_v34 = vpop.permute.xlu0 %167 }
 0x1e5   :  { %v166_v32 = vsel %vm158_vm6, %v161_v29, %v164_v30  ;;  %v170_v36 = vsel %vm158_vm6, %v156_v28, %v168_v34 }
 0x1e6   :  { %v313_v33 = vpack.c.bf16 %v166_v32, %v159_v31 }
 0x1e8   :  { %314 = vmatpush3.bf16.msra.mxu1 %v313_v33  ;;  %v250_v37 = vpop.permute.xlu0 %249 }
 0x1e9   :  { %304 = vmatprep.subr.mxu1 %v385_v1  ;;  %v252_v42 = vsel %vm158_vm6, %v55_v15, %v250_v37 }
 0x1ec   :  { %305 = vmatpush3.msra.mxu1 %v170_v36 }
 0x1ed   :  { %307 = vmatmul.mubr.msk.f32.vlgmr.msra.gmra.mrb[0].mxu1 %vm66_vm5, %v35_v35 }
 0x1f5   :  { %v174_v38 = vpop.permute.xlu1 %173 }
 0x2c0   :  { %v245_v39 = vpop.f32.mrb[0].mxu1 }
 0x2c1   :  { %v246_v40 = vadd.f32 %v245_v39, %v174_v38  ;;  %v308_v41 = vpop.f32.mrb[1].mxu1 }
 0x2c3   :  { %v253_v43 = vadd.f32 %v252_v42, %v246_v40 }
 0x2c5   :  { %v254_v44 = vmax.f32 %v253_v43, 0.0 }
 0x2c7   :  { %255 = vst.msk [vmem:[#allocation5] sm:$0xff] %vm158_vm6, %v254_v44  ;;  %257 = vrot.lane.b32.xlu1 %v254_v44, %s395_s4 }
 0x339   :  { %v258_v45 = vpop.permute.xlu1 %257 }
 0x33a   :  { %261 = vst.msk [vmem:[#allocation5 + $0x8] sm:$0xff] %vm158_vm6, %v258_v45 }
 0x33b   :  { %367 = shalt.err (!%p364_p12)
}
 0x33c   :  { %s368_s24 = scalar_lea.hbm %s494_s5, 256 }
 0x33d   :  { %p369_p13 = scmp.ne.s32.totalorder %s494_s5, %s368_s24  ;;  %p372_p0 = scmp.lt.u32.totalorder %s368_s24, %s494_s5 }
 0x33f   :  { %p374_p1 = pnand %p372_p0, %p369_p13 }
 0x341   :  { %377 = shalt.err (!%p374_p1)
}
 0x342   :  { %s397_s29 = smov 128   ;;  %s398_s30 = smov 8  }
 0x343   :  { %273 = dma.vmem_to_hbm [thread:$0]  %s268_s3, 256, %s494_s5, [#allocation4], %s397_s29, %s397_s29, %s398_s30  }
 0x344   :  { %380 = dma.done.wait [#allocation4], 256  }
 0x345   :  { %381 = vsyncadd [#allocation4], 4294967040 }
 0x346   :  { %277 = vsyncpa [#allocation3], 1 }
 0x347   :  { %278 = vsyncpa [#allocation4], 1 }

</bundles_post_ra>
